<compile_context>
chip_gen: v7x
topology: tpu7x:2x2x1
jax: 0.10.0
libtpu: 0.0.40
codegen_flags: <defaults>
</compile_context>

<pallas_src>
import math
import functools

import jax
import jax.numpy as jnp
from jax import lax
from jax.experimental import pallas as pl
from jax.experimental.pallas import tpu as pltpu


ROW_TILE = 256  # token rows per grid step (multiple of 8 for f32, 32 for int8)


def _token_embedding_kernel(
    tok_ref,    # (R, D) bf16 gathered token-embedding rows
    pos_ref,    # (R, D) bf16 positional-embedding rows
    mask_ref,   # (R, D) int8  {0, 1} dropout keep mask
    gamma_ref,  # (1, D) f32
    beta_ref,   # (1, D) f32
    out_ref,    # (R, D) f32
    *, embed_scale, inv_keep, eps,
):
    # scale * token_embedding + positional_embedding, compute in f32
    x = embed_scale * tok_ref[...].astype(jnp.float32) \
        + pos_ref[...].astype(jnp.float32)

    # inverted dropout with a precomputed {0,1} keep mask
    x = x * (mask_ref[...].astype(jnp.float32) * inv_keep)

    # LayerNorm over the embedding dim (lane axis)
    mean = jnp.mean(x, axis=-1, keepdims=True)
    xc = x - mean
    var = jnp.mean(xc * xc, axis=-1, keepdims=True)
    xhat = xc * lax.rsqrt(var + eps)
    out_ref[...] = (xhat * gamma_ref[...] + beta_ref[...]).astype(out_ref.dtype)


def token_embedding_forward(
    src_tokens,         # (B, T) int32
    embed_tokens_w,     # (V, D) float32
    embed_positions_w,  # (P, D) float32, P >= T
    ln_gamma,           # (D,)   float32
    ln_beta,            # (D,)   float32
    *,
    embed_scale,
    dropout_p=0.3,
    eps=1e-5,
    seed=0,
    table_dtype=jnp.bfloat16,
    row_tile=ROW_TILE,
):
    B, T = src_tokens.shape
    V, D = embed_tokens_w.shape
    N = B * T
    keep_prob = 1.0 - float(dropout_p)

    num_tiles = -(-N // row_tile)          # cdiv
    n_pad = num_tiles * row_tile
    pad = n_pad - N

    # T-major token order: row index = t*B + b, so the kernel output slab
    # reshapes straight to (T, B, D) with no transpose afterwards.
    tokens_tm = src_tokens.transpose(1, 0).reshape(N).astype(jnp.int32)
    tokens_tm = jnp.pad(tokens_tm, (0, pad))           # pad rows -> token id 0

    # bf16 tables: halves bytes on the dominant HBM read path (esp. v5e).
    tok_tab = embed_tokens_w.astype(table_dtype)
    pos_tab = embed_positions_w.astype(table_dtype)

    # Vocab-row gather (XLA); kernel then streams contiguous (R, D) tiles.
    tok_rows = jnp.take(tok_tab, tokens_tm, axis=0)               # (n_pad, D)

    # Positional rows: position = row // B  (contiguous broadcast, no gather).
    pos_rows = jnp.broadcast_to(pos_tab[:T, None, :], (T, B, D)).reshape(N, D)
    pos_rows = jnp.pad(pos_rows, ((0, pad), (0, 0)))              # (n_pad, D)

    # Dropout keep mask (int8 {0,1}) -> 1 byte/elem of extra HBM traffic.
    keep = jax.random.bernoulli(
        jax.random.PRNGKey(seed), p=keep_prob, shape=(n_pad, D)
    ).astype(jnp.int8)

    gamma2 = ln_gamma.reshape(1, D).astype(jnp.float32)
    beta2 = ln_beta.reshape(1, D).astype(jnp.float32)

    kernel = functools.partial(
        _token_embedding_kernel,
        embed_scale=float(embed_scale),
        inv_keep=float(1.0 / keep_prob),
        eps=float(eps),
    )

    out_flat = pl.pallas_call(
        kernel,
        out_shape=jax.ShapeDtypeStruct((n_pad, D), jnp.float32),
        grid=(num_tiles,),
        in_specs=[
            pl.BlockSpec((row_tile, D), lambda i: (i, 0)),   # token rows
            pl.BlockSpec((row_tile, D), lambda i: (i, 0)),   # positional rows
            pl.BlockSpec((row_tile, D), lambda i: (i, 0)),   # keep mask
            pl.BlockSpec((1, D), lambda i: (0, 0)),          # gamma
            pl.BlockSpec((1, D), lambda i: (0, 0)),          # beta
        ],
        out_specs=pl.BlockSpec((row_tile, D), lambda i: (i, 0)),
        compiler_params=pltpu.CompilerParams(
            dimension_semantics=("parallel",),               # independent tiles
        ),
    )(tok_rows, pos_rows, keep, gamma2, beta2)

    # (n_pad, D) -> (N, D) -> (T, B, D); already in the PyTorch output layout.
    return out_flat[:N].reshape(T, B, D)


if __name__ == "__main__":
    # Small, deterministic synthetic setup.
    B, T = 2, 8          # batch, sequence
    V = 50               # vocab size
    P = 64               # max positions
    D = 128              # embedding dim (lane-dense)
    dropout_p = 0.3
    seed = 0

    key = jax.random.PRNGKey(0)
    k_tok, k_emb, k_pos, k_g, k_b = jax.random.split(key, 5)

    src_tokens = jax.random.randint(k_tok, (B, T), 0, V, dtype=jnp.int32)
    embed_tokens_w = jax.random.normal(k_emb, (V, D), dtype=jnp.float32) * 0.02
    embed_positions_w = jax.random.normal(k_pos, (P, D), dtype=jnp.float32) * 0.02
    ln_gamma = 1.0 + 0.01 * jax.random.normal(k_g, (D,), dtype=jnp.float32)
    ln_beta = 0.01 * jax.random.normal(k_b, (D,), dtype=jnp.float32)

    embed_scale = math.sqrt(D)

    out = token_embedding_forward(
        src_tokens,
        embed_tokens_w,
        embed_positions_w,
        ln_gamma,
        ln_beta,
        embed_scale=embed_scale,
        dropout_p=dropout_p,
        seed=seed,
    )
    out = jax.block_until_ready(out)

    assert out.shape == (T, B, D), out.shape
    assert out.dtype == jnp.float32
    assert bool(jnp.all(jnp.isfinite(out)))

    # Pure-JAX reference with the identical mask / bf16 tables.
    keep_prob = 1.0 - dropout_p
    tok_tab = embed_tokens_w.astype(jnp.bfloat16).astype(jnp.float32)
    pos_tab = embed_positions_w.astype(jnp.bfloat16).astype(jnp.float32)
    x = embed_scale * tok_tab[src_tokens] + pos_tab[:T][None, :, :]   # (B,T,D)
    x = x.transpose(1, 0, 2)                                          # (T,B,D)
    n_pad = (-(-(B * T) // ROW_TILE)) * ROW_TILE
    keep = jax.random.bernoulli(jax.random.PRNGKey(seed), p=keep_prob,
                                shape=(n_pad, D)).astype(jnp.float32)
    x = x * keep[: B * T].reshape(T, B, D) * (1.0 / keep_prob)
    mean = x.mean(-1, keepdims=True)
    xc = x - mean
    var = (xc * xc).mean(-1, keepdims=True)
    ref = (xc / jnp.sqrt(var + 1e-5)) * ln_gamma + ln_beta
    assert bool(jnp.allclose(out, ref, atol=2e-3, rtol=2e-3))

    print("KERNEL_OK")
</pallas_src>

<mosaic_0001>
module attributes {stable_mosaic.version = 11 : i64} {
  func.func @_token_embedding_kernel(%arg0: i32, %arg1: memref<256x128xbf16, #tpu.memory_space<vmem>>, %arg2: memref<256x128xbf16, #tpu.memory_space<vmem>>, %arg3: memref<256x128xi8, #tpu.memory_space<vmem>>, %arg4: memref<1x128xf32, #tpu.memory_space<vmem>>, %arg5: memref<1x128xf32, #tpu.memory_space<vmem>>, %arg6: memref<256x128xf32, #tpu.memory_space<vmem>>) attributes {dimension_semantics = [#tpu.dimension_semantics<parallel>], iteration_bounds = array<i64: 1>, scalar_prefetch = 0 : i64, scratch_operands = 0 : i64, tpu.core_type = #tpu.core_type<tc>, window_params = [{transform_indices = @transform_0, window_bounds = array<i64: 256, 128>}, {transform_indices = @transform_1, window_bounds = array<i64: 256, 128>}, {transform_indices = @transform_2, window_bounds = array<i64: 256, 128>}, {pipeline_mode = #tpu.pipeline_mode<synchronous>, transform_indices = @transform_3, window_bounds = array<i64: 1, 128>}, {pipeline_mode = #tpu.pipeline_mode<synchronous>, transform_indices = @transform_4, window_bounds = array<i64: 1, 128>}, {transform_indices = @transform_5, window_bounds = array<i64: 256, 128>}]} {
    %c0 = arith.constant 0 : index
    %c0_0 = arith.constant 0 : index
    %0 = vector.load %arg1[%c0, %c0_0] : memref<256x128xbf16, #tpu.memory_space<vmem>>, vector<256x128xbf16>
    %1 = arith.extf %0 : vector<256x128xbf16> to vector<256x128xf32>
    %cst = arith.constant 11.3137083 : f32
    %2 = vector.broadcast %cst : f32 to vector<256x128xf32>
    %3 = arith.mulf %2, %1 : vector<256x128xf32>
    %c0_1 = arith.constant 0 : index
    %c0_2 = arith.constant 0 : index
    %4 = vector.load %arg2[%c0_1, %c0_2] : memref<256x128xbf16, #tpu.memory_space<vmem>>, vector<256x128xbf16>
    %5 = arith.extf %4 : vector<256x128xbf16> to vector<256x128xf32>
    %6 = arith.addf %3, %5 : vector<256x128xf32>
    %c0_3 = arith.constant 0 : index
    %c0_4 = arith.constant 0 : index
    %7 = vector.load %arg3[%c0_3, %c0_4] : memref<256x128xi8, #tpu.memory_space<vmem>>, vector<256x128xi8>
    %8 = arith.sitofp %7 : vector<256x128xi8> to vector<256x128xf32>
    %cst_5 = arith.constant 1.42857146 : f32
    %9 = vector.broadcast %cst_5 : f32 to vector<256x128xf32>
    %10 = arith.mulf %8, %9 : vector<256x128xf32>
    %11 = arith.mulf %6, %10 : vector<256x128xf32>
    %cst_6 = arith.constant dense<0.000000e+00> : vector<256xf32>
    %12 = vector.multi_reduction <add>, %11, %cst_6 [1] : vector<256x128xf32> to vector<256xf32>
    %13 = vector.shape_cast %12 : vector<256xf32> to vector<256x1xf32>
    %cst_7 = arith.constant 1.280000e+02 : f32
    %14 = vector.broadcast %cst_7 : f32 to vector<256x1xf32>
    %15 = arith.divf %13, %14 : vector<256x1xf32>
    %16 = vector.broadcast %15 : vector<256x1xf32> to vector<256x128xf32>
    %17 = arith.subf %11, %16 : vector<256x128xf32>
    %18 = arith.mulf %17, %17 : vector<256x128xf32>
    %cst_8 = arith.constant dense<0.000000e+00> : vector<256xf32>
    %19 = vector.multi_reduction <add>, %18, %cst_8 [1] : vector<256x128xf32> to vector<256xf32>
    %20 = vector.shape_cast %19 : vector<256xf32> to vector<256x1xf32>
    %cst_9 = arith.constant 1.280000e+02 : f32
    %21 = vector.broadcast %cst_9 : f32 to vector<256x1xf32>
    %22 = arith.divf %20, %21 : vector<256x1xf32>
    %cst_10 = arith.constant 9.99999974E-6 : f32
    %23 = vector.broadcast %cst_10 : f32 to vector<256x1xf32>
    %24 = arith.addf %22, %23 : vector<256x1xf32>
    %25 = math.rsqrt %24 : vector<256x1xf32>
    %26 = vector.broadcast %25 : vector<256x1xf32> to vector<256x128xf32>
    %27 = arith.mulf %17, %26 : vector<256x128xf32>
    %c0_11 = arith.constant 0 : index
    %c0_12 = arith.constant 0 : index
    %28 = vector.load %arg4[%c0_11, %c0_12] : memref<1x128xf32, #tpu.memory_space<vmem>>, vector<1x128xf32>
    %29 = vector.broadcast %28 : vector<1x128xf32> to vector<256x128xf32>
    %30 = arith.mulf %27, %29 : vector<256x128xf32>
    %c0_13 = arith.constant 0 : index
    %c0_14 = arith.constant 0 : index
    %31 = vector.load %arg5[%c0_13, %c0_14] : memref<1x128xf32, #tpu.memory_space<vmem>>, vector<1x128xf32>
    %32 = vector.broadcast %31 : vector<1x128xf32> to vector<256x128xf32>
    %33 = arith.addf %30, %32 : vector<256x128xf32>
    %c0_15 = arith.constant 0 : index
    %c0_16 = arith.constant 0 : index
    %34 = vector.load %arg6[%c0_15, %c0_16] : memref<256x128xf32, #tpu.memory_space<vmem>>, vector<256x128xf32>
    tpu.vector_store %arg6[%c0_15, %c0_16], %33 {strides = array<i32>} : memref<256x128xf32, #tpu.memory_space<vmem>>, vector<256x128xf32>,
    return
  }
  func.func @transform_0(%arg0: i32) -> (i32, i32) {
    %c0_i32 = arith.constant 0 : i32
    %c0_i32_0 = arith.constant 0 : i32
    return %arg0, %c0_i32 : i32, i32
  }
  func.func @transform_1(%arg0: i32) -> (i32, i32) {
    %c0_i32 = arith.constant 0 : i32
    %c0_i32_0 = arith.constant 0 : i32
    return %arg0, %c0_i32 : i32, i32
  }
  func.func @transform_2(%arg0: i32) -> (i32, i32) {
    %c0_i32 = arith.constant 0 : i32
    %c0_i32_0 = arith.constant 0 : i32
    return %arg0, %c0_i32 : i32, i32
  }
  func.func @transform_3(%arg0: i32) -> (i32, i32) {
    %c0_i32 = arith.constant 0 : i32
    %c0_i32_0 = arith.constant 0 : i32
    %c0_i32_1 = arith.constant 0 : i32
    return %c0_i32, %c0_i32_0 : i32, i32
  }
  func.func @transform_4(%arg0: i32) -> (i32, i32) {
    %c0_i32 = arith.constant 0 : i32
    %c0_i32_0 = arith.constant 0 : i32
    %c0_i32_1 = arith.constant 0 : i32
    return %c0_i32, %c0_i32_0 : i32, i32
  }
  func.func @transform_5(%arg0: i32) -> (i32, i32) {
    %c0_i32 = arith.constant 0 : i32
    %c0_i32_0 = arith.constant 0 : i32
    return %arg0, %c0_i32 : i32, i32
  }
}

</mosaic_0001>

<bundles_post_ra>
// kernel: tpu_custom_call.1
= control target key start
LH: loop header
LB: loop body
LE: loop exit
PB: predicated region body
PF: predicated region fallthrough
CT: control target
= control target key end

     0   :  { %10 = vsyncpa [#allocation3], 0  ;;  %s1658_s0 = inlined_call_operand.hbm [shape: bf16[256,128], index: 0, kind: input, shape index: {}]   ;;  %s1659_s1 = inlined_call_operand.hbm [shape: bf16[256,128], index: 1, kind: input, shape index: {}]   ;;  %s1660_s2 = inlined_call_operand.hbm [shape: s8[256,128], index: 2, kind: input, shape index: {}]   ;;  %s1661_s3 = inlined_call_operand.vmem [shape: f32[1,128], index: 3, kind: input, shape index: {}]   ;;  %s1662_s4 = inlined_call_operand.vmem [shape: f32[1,128], index: 4, kind: input, shape index: {}]   ;;  %s1663_s5 = inlined_call_operand.hbm [shape: f32[256,128], index: 5, kind: output, shape index: {}]  }
   0x1   :  { %11 = vsyncpa [#allocation6], 0 }
   0x2   :  { %12 = vsyncpa [#allocation4], 0  ;;  %s1197_s18 = smov [#allocation5]   ;;  %s1198_s20 = smov [#allocation2]  }
   0x3   :  { %s30_s19 = sshll.u32 %s1197_s18, 4  ;;  %s18_s21 = sshll.u32 %s1198_s20, 4  ;;  %s31_s19 = int_to_ptr.vmem [resolvable:$true] %s30_s19  ;;  %s1235_s21 = int_to_ptr.vmem [resolvable:$true] %s18_s21 }
   0x4   :  { %s1103_s24 = scalar_lea.hbm %s1659_s1, 2048 }
   0x5   :  { %p1104_p0 = scmp.ne.s32.totalorder %s1659_s1, %s1103_s24  ;;  %p1107_p1 = scmp.lt.u32.totalorder %s1103_s24, %s1659_s1 }
   0x7   :  { %p1109_p2 = pnand %p1107_p1, %p1104_p0 }
   0x9   :  { %1112 = shalt.err (!%p1109_p2)
}
   0xa   :  { %s1113_s29 = scalar_lea.vmem %s31_s19, 2048  ;;  %p1118_p4 = scmp.lt.s32.totalorder %s31_s19, %s31_s19 }
   0xb   :  { %p1114_p3 = scmp.ne.s32.totalorder %s31_s19, %s1113_s29  ;;  %p1119_p5 = scmp.lt.s32.totalorder %s1113_s29, %s1113_s29 }
   0xd   :  { %p1120_p6 = por %p1119_p5, %p1118_p4 }
   0xf   :  { %p1121_p7 = pnand %p1120_p6, %p1114_p3 }
  0x11   :  { %1124 = shalt.err (!%p1121_p7)
}
  0x12   :  { %s1199_s30 = smov 64   ;;  %s1200_s6 = smov 4  }
  0x13   :  { %36 = dma.hbm_to_vmem [thread:$0]  %s1659_s1, 2048, %s31_s19, [#allocation6], %s1199_s30, %s1199_s30, %s1200_s6  }
  0x14   :  { %s1125_s11 = scalar_lea.hbm %s1658_s0, 2048 }
  0x15   :  { %p1126_p8 = scmp.ne.s32.totalorder %s1658_s0, %s1125_s11  ;;  %p1129_p9 = scmp.lt.u32.totalorder %s1125_s11, %s1658_s0 }
  0x17   :  { %p1131_p10 = pnand %p1129_p9, %p1126_p8 }
  0x19   :  { %1134 = shalt.err (!%p1131_p10)
}
  0x1a   :  { %s1135_s16 = scalar_lea.vmem %s1235_s21, 2048  ;;  %p1140_p12 = scmp.lt.s32.totalorder %s1235_s21, %s1235_s21 }
  0x1b   :  { %p1136_p11 = scmp.ne.s32.totalorder %s1235_s21, %s1135_s16  ;;  %p1141_p13 = scmp.lt.s32.totalorder %s1135_s16, %s1135_s16 }
  0x1d   :  { %p1142_p0 = por %p1141_p13, %p1140_p12 }
  0x1f   :  { %p1143_p1 = pnand %p1142_p0, %p1136_p11 }
  0x21   :  { %1146 = shalt.err (!%p1143_p1)
}
  0x22   :  { %24 = dma.hbm_to_vmem [thread:$0]  %s1658_s0, 2048, %s1235_s21, [#allocation3], %s1199_s30, %s1199_s30, %s1200_s6  }
  0x23   :  { %s1201_s18 = smov [#allocation7]   ;;  %s1147_s23 = scalar_lea.hbm %s1660_s2, 1024 }
  0x24   :  { %s42_s19 = sshll.u32 %s1201_s18, 4  ;;  %p1148_p2 = scmp.ne.s32.totalorder %s1660_s2, %s1147_s23  ;;  %s43_s19 = int_to_ptr.vmem [resolvable:$true] %s42_s19 }
  0x25   :  { %p1151_p3 = scmp.lt.u32.totalorder %s1147_s23, %s1660_s2 }
  0x27   :  { %p1153_p4 = pnand %p1151_p3, %p1148_p2 }
  0x29   :  { %1156 = shalt.err (!%p1153_p4)
}
  0x2a   :  { %s1157_s28 = scalar_lea.vmem %s43_s19, 1024  ;;  %p1162_p6 = scmp.lt.s32.totalorder %s43_s19, %s43_s19 }
  0x2b   :  { %p1158_p5 = scmp.ne.s32.totalorder %s43_s19, %s1157_s28  ;;  %p1163_p7 = scmp.lt.s32.totalorder %s1157_s28, %s1157_s28 }
  0x2d   :  { %p1164_p8 = por %p1163_p7, %p1162_p6 }
  0x2f   :  { %p1165_p9 = pnand %p1164_p8, %p1158_p5 }
  0x31   :  { %1168 = shalt.err (!%p1165_p9)
}
  0x32   :  { %s1202_s0 = smov 128   ;;  %s1203_s21 = smov 8  }
  0x33   :  { %48 = dma.hbm_to_vmem [thread:$0]  %s1660_s2, 1024, %s43_s19, [#allocation6], %s1202_s0, %s1202_s0, %s1203_s21  }
  0x34   :  { %1191 = dma.done.wait [#allocation3], 2048  }
  0x35   :  { %1192 = vsyncadd [#allocation3], 4294965248 }
  0x36   :  { %1193 = dma.done.wait [#allocation6], 3072  }
  0x37   :  { %1194 = vsyncadd [#allocation6], 4294964224  ;;  %v874_v0 = vld [vmem:[#allocation2] sm:$0xff]   ;;  %v1001_v6 = vld [vmem:[#allocation2 + $0x8] sm:$0xff]  }
  0x38   :  { %v938_v1 = vld [vmem:[#allocation5] sm:$0xff]   ;;  %v875_v3 = vunpack.c.l.bf16 %v874_v0  ;;  %v1016_v7 = vld [vmem:[#allocation5 + $0x8] sm:$0xff]   ;;  %v879_v9 = vunpack.c.l.bf16 %v1001_v6  ;;  %v876_v11 = vunpack.c.h.bf16 %v874_v0  ;;  %v880_v19 = vunpack.c.h.bf16 %v1001_v6  ;;  %v1002_v21 = vld [vmem:[#allocation2 + $0x10] sm:$0xff]  }
  0x39   :  { %v254_v2 = vld [vmem:[#allocation7] sm:$0xff]  ;;  %v939_v4 = vunpack.c.l.bf16 %v938_v1  ;;  %v943_v10 = vunpack.c.l.bf16 %v1016_v7  ;;  %v940_v12 = vunpack.c.h.bf16 %v938_v1  ;;  %v944_v20 = vunpack.c.h.bf16 %v1016_v7  ;;  %v1017_v22 = vld [vmem:[#allocation5 + $0x10] sm:$0xff]   ;;  %v255_v27 = vld [vmem:[#allocation7 + $0x8] sm:$0xff] }
  0x3a   :  { %v262_v5 = vunpack.c.0.s8 %v254_v2  ;;  %v264_v8 = vunpack.c.2.s8 %v254_v2  ;;  %v126_v13 = vmul.f32 11.313708, %v875_v3  ;;  %v263_v16 = vunpack.c.1.s8 %v254_v2  ;;  %v1003_v36 = vld [vmem:[#allocation2 + $0x18] sm:$0xff]   ;;  %v1004_v58 = vld [vmem:[#allocation2 + $0x20] sm:$0xff]   ;;  %v256_v0 = vld [vmem:[#allocation7 + $0x10] sm:$0xff] }
  0x3b   :  { %v128_v17 = vmul.f32 11.313708, %v879_v9  ;;  %v127_v18 = vmul.f32 11.313708, %v876_v11  ;;  %v129_v30 = vmul.f32 11.313708, %v880_v19  ;;  %v265_v31 = vunpack.c.3.s8 %v254_v2 }
  0x3c   :  { %v294_v14 = vcvt.s32.f32 %v262_v5  ;;  %v296_v15 = vcvt.s32.f32 %v264_v8  ;;  %v222_v23 = vadd.f32 %v939_v4, %v126_v13  ;;  %v295_v26 = vcvt.s32.f32 %v263_v16  ;;  %v1018_v41 = vld [vmem:[#allocation5 + $0x18] sm:$0xff]   ;;  %v1019_v59 = vld [vmem:[#allocation5 + $0x20] sm:$0xff]   ;;  %v1005_v13 = vld [vmem:[#allocation2 + $0x28] sm:$0xff]  }
  0x3d   :  { %v224_v28 = vadd.f32 %v943_v10, %v128_v17  ;;  %v223_v29 = vadd.f32 %v940_v12, %v127_v18  ;;  %v883_v34 = vunpack.c.l.bf16 %v1002_v21  ;;  %v947_v35 = vunpack.c.l.bf16 %v1017_v22 }
  0x3e   :  { %v326_v24 = vmul.f32 1.4285715, %v294_v14  ;;  %v328_v25 = vmul.f32 1.4285715, %v296_v15  ;;  %v327_v33 = vmul.f32 1.4285715, %v295_v26  ;;  %v225_v38 = vadd.f32 %v944_v20, %v129_v30 }
  0x3f   :  { %v297_v39 = vcvt.s32.f32 %v265_v31  ;;  %v266_v40 = vunpack.c.0.s8 %v255_v27  ;;  %v130_v43 = vmul.f32 11.313708, %v883_v34  ;;  %v884_v44 = vunpack.c.h.bf16 %v1002_v21  ;;  %v1020_v14 = vld [vmem:[#allocation5 + $0x28] sm:$0xff]  }
  0x40   :  { %v1281_v32 = vmul.f32 %v326_v24, %v222_v23  ;;  %v1283_v37 = vmul.f32 %v328_v25, %v224_v28  ;;  %v1286_v42 = vmul.f32 %v327_v33, %v223_v29  ;;  %v948_v45 = vunpack.c.h.bf16 %v1017_v22  ;;  %v1021_v33 = vld [vmem:[#allocation5 + $0x30] sm:$0xff]  }
  0x41   :  { %v329_v46 = vmul.f32 1.4285715, %v297_v39  ;;  %v298_v47 = vcvt.s32.f32 %v266_v40  ;;  %v267_v48 = vunpack.c.1.s8 %v255_v27  ;;  %v887_v49 = vunpack.c.l.bf16 %v1003_v36  ;;  %v257_v39 = vld [vmem:[#allocation7 + $0x18] sm:$0xff] }
  0x42   :  { %390 = vadd.xlane.f32.xlu0 %v1281_v32  ;;  %394 = vadd.xlane.f32.xlu1 %v1283_v37  ;;  %v226_v50 = vadd.f32 %v947_v35, %v130_v43  ;;  %v131_v51 = vmul.f32 11.313708, %v884_v44  ;;  %v951_v52 = vunpack.c.l.bf16 %v1018_v41  ;;  %v268_v53 = vunpack.c.2.s8 %v255_v27 }
  0x43   :  { %v1289_v54 = vmul.f32 %v329_v46, %v225_v38  ;;  %v330_v55 = vmul.f32 1.4285715, %v298_v47  ;;  %v299_v56 = vcvt.s32.f32 %v267_v48  ;;  %v132_v57 = vmul.f32 11.313708, %v887_v49 }
  0x44   :  { %v227_v60 = vadd.f32 %v948_v45, %v131_v51  ;;  %v300_v61 = vcvt.s32.f32 %v268_v53  ;;  %v888_v62 = vunpack.c.h.bf16 %v1003_v36  ;;  %v952_v63 = vunpack.c.h.bf16 %v1018_v41  ;;  %v1007_v53 = vld [vmem:[#allocation2 + $0x38] sm:$0xff]  }
  0x45   :  { %v1293_v1 = vmul.f32 %v330_v55, %v226_v50  ;;  %v331_v2 = vmul.f32 1.4285715, %v299_v56  ;;  %v228_v3 = vadd.f32 %v951_v52, %v132_v57  ;;  %v269_v4 = vunpack.c.3.s8 %v255_v27  ;;  %v1006_v27 = vld [vmem:[#allocation2 + $0x30] sm:$0xff]   ;;  %v1022_v55 = vld [vmem:[#allocation5 + $0x38] sm:$0xff]  }
  0x46   :  { %392 = vadd.xlane.f32.xlu0 %v1286_v42  ;;  %396 = vadd.xlane.f32.xlu1 %v1289_v54  ;;  %v332_v5 = vmul.f32 1.4285715, %v300_v61  ;;  %v133_v6 = vmul.f32 11.313708, %v888_v62  ;;  %v891_v7 = vunpack.c.l.bf16 %v1004_v58  ;;  %v955_v8 = vunpack.c.l.bf16 %v1019_v59 }
  0x47   :  { %v1295_v9 = vmul.f32 %v331_v2, %v227_v60  ;;  %v301_v10 = vcvt.s32.f32 %v269_v4  ;;  %v270_v11 = vunpack.c.0.s8 %v256_v0  ;;  %v892_v12 = vunpack.c.h.bf16 %v1004_v58 }
  0x48   :  { %v1298_v15 = vmul.f32 %v332_v5, %v228_v3  ;;  %v229_v16 = vadd.f32 %v952_v63, %v133_v6  ;;  %v134_v17 = vmul.f32 11.313708, %v891_v7  ;;  %v956_v18 = vunpack.c.h.bf16 %v1019_v59 }
  0x49   :  { %v333_v19 = vmul.f32 1.4285715, %v301_v10  ;;  %v302_v20 = vcvt.s32.f32 %v270_v11  ;;  %v135_v21 = vmul.f32 11.313708, %v892_v12  ;;  %v271_v22 = vunpack.c.1.s8 %v256_v0  ;;  %v1008_v10 = vld [vmem:[#allocation2 + $0x40] sm:$0xff]  }
  0x4a   :  { %398 = vadd.xlane.f32.xlu0 %v1293_v1  ;;  %400 = vadd.xlane.f32.xlu1 %v1295_v9  ;;  %v230_v23 = vadd.f32 %v955_v8, %v134_v17  ;;  %v895_v24 = vunpack.c.l.bf16 %v1005_v13  ;;  %v959_v25 = vunpack.c.l.bf16 %v1020_v14  ;;  %v272_v26 = vunpack.c.2.s8 %v256_v0  ;;  %v1023_v11 = vld [vmem:[#allocation5 + $0x40] sm:$0xff]  }
  0x4b   :  { %v1301_v28 = vmul.f32 %v333_v19, %v229_v16  ;;  %v334_v29 = vmul.f32 1.4285715, %v302_v20  ;;  %v231_v30 = vadd.f32 %v956_v18, %v135_v21  ;;  %v303_v31 = vcvt.s32.f32 %v271_v22  ;;  %v258_v17 = vld [vmem:[#allocation7 + $0x20] sm:$0xff] }
  0x4c   :  { %v136_v34 = vmul.f32 11.313708, %v895_v24  ;;  %v304_v35 = vcvt.s32.f32 %v272_v26  ;;  %v896_v36 = vunpack.c.h.bf16 %v1005_v13  ;;  %v960_v38 = vunpack.c.h.bf16 %v1020_v14  ;;  %v1009_v26 = vld [vmem:[#allocation2 + $0x48] sm:$0xff]  }
  0x4d   :  { %v1305_v40 = vmul.f32 %v334_v29, %v230_v23  ;;  %v335_v41 = vmul.f32 1.4285715, %v303_v31  ;;  %v273_v43 = vunpack.c.3.s8 %v256_v0  ;;  %v899_v44 = vunpack.c.l.bf16 %v1006_v27 }
  0x4e   :  { %402 = vadd.xlane.f32.xlu0 %v1298_v15  ;;  %404 = vadd.xlane.f32.xlu1 %v1301_v28  ;;  %v232_v45 = vadd.f32 %v959_v25, %v136_v34  ;;  %v336_v46 = vmul.f32 1.4285715, %v304_v35  ;;  %v137_v47 = vmul.f32 11.313708, %v896_v36  ;;  %v963_v48 = vunpack.c.l.bf16 %v1021_v33 }
  0x4f   :  { %v1307_v49 = vmul.f32 %v335_v41, %v231_v30  ;;  %v305_v50 = vcvt.s32.f32 %v273_v43  ;;  %v138_v51 = vmul.f32 11.313708, %v899_v44  ;;  %v274_v52 = vunpack.c.0.s8 %v257_v39 }
  0x50   :  { %v1310_v56 = vmul.f32 %v336_v46, %v232_v45  ;;  %v233_v57 = vadd.f32 %v960_v38, %v137_v47  ;;  %v900_v58 = vunpack.c.h.bf16 %v1006_v27  ;;  %v964_v59 = vunpack.c.h.bf16 %v1021_v33  ;;  %v1024_v33 = vld [vmem:[#allocation5 + $0x48] sm:$0xff]  }
  0x51   :  { %v337_v60 = vmul.f32 1.4285715, %v305_v50  ;;  %v234_v61 = vadd.f32 %v963_v48, %v138_v51  ;;  %v306_v62 = vcvt.s32.f32 %v274_v52  ;;  %v275_v63 = vunpack.c.1.s8 %v257_v39 }
  0x52   :  { %406 = vadd.xlane.f32.xlu0 %v1305_v40  ;;  %408 = vadd.xlane.f32.xlu1 %v1307_v49  ;;  %v139_v0 = vmul.f32 11.313708, %v900_v58  ;;  %v903_v2 = vunpack.c.l.bf16 %v1007_v53  ;;  %v967_v3 = vunpack.c.l.bf16 %v1022_v55  ;;  %v276_v4 = vunpack.c.2.s8 %v257_v39 }
  0x53   :  { %v1313_v5 = vmul.f32 %v337_v60, %v233_v57  ;;  %v338_v6 = vmul.f32 1.4285715, %v306_v62  ;;  %v307_v7 = vcvt.s32.f32 %v275_v63  ;;  %v904_v8 = vunpack.c.h.bf16 %v1007_v53  ;;  %v1025_v57 = vld [vmem:[#allocation5 + $0x50] sm:$0xff]   ;;  %v259_v62 = vld [vmem:[#allocation7 + $0x28] sm:$0xff] }
  0x54   :  { %v235_v12 = vadd.f32 %v964_v59, %v139_v0  ;;  %v140_v13 = vmul.f32 11.313708, %v903_v2  ;;  %v308_v14 = vcvt.s32.f32 %v276_v4  ;;  %v968_v16 = vunpack.c.h.bf16 %v1022_v55  ;;  %v1010_v55 = vld [vmem:[#allocation2 + $0x50] sm:$0xff]  }
  0x55   :  { %v1317_v18 = vmul.f32 %v338_v6, %v234_v61  ;;  %v339_v19 = vmul.f32 1.4285715, %v307_v7  ;;  %v141_v20 = vmul.f32 11.313708, %v904_v8  ;;  %v277_v21 = vunpack.c.3.s8 %v257_v39 }
  0x56   :  { %410 = vadd.xlane.f32.xlu0 %v1310_v56  ;;  %412 = vadd.xlane.f32.xlu1 %v1313_v5  ;;  %v236_v22 = vadd.f32 %v967_v3, %v140_v13  ;;  %v340_v23 = vmul.f32 1.4285715, %v308_v14  ;;  %v907_v24 = vunpack.c.l.bf16 %v1008_v10  ;;  %v971_v25 = vunpack.c.l.bf16 %v1023_v11  ;;  %v1011_v14 = vld [vmem:[#allocation2 + $0x58] sm:$0xff]  }
  0x57   :  { %v1319_v27 = vmul.f32 %v339_v19, %v235_v12  ;;  %v237_v29 = vadd.f32 %v968_v16, %v141_v20  ;;  %v309_v30 = vcvt.s32.f32 %v277_v21  ;;  %v278_v31 = vunpack.c.0.s8 %v258_v17  ;;  %v1026_v16 = vld [vmem:[#allocation5 + $0x58] sm:$0xff]  }
  0x58   :  { %v1322_v34 = vmul.f32 %v340_v23, %v236_v22  ;;  %v142_v35 = vmul.f32 11.313708, %v907_v24  ;;  %v908_v36 = vunpack.c.h.bf16 %v1008_v10  ;;  %v972_v38 = vunpack.c.h.bf16 %v1023_v11 }
  0x59   :  { %v341_v39 = vmul.f32 1.4285715, %v309_v30  ;;  %v310_v41 = vcvt.s32.f32 %v278_v31  ;;  %v279_v43 = vunpack.c.1.s8 %v258_v17  ;;  %v911_v44 = vunpack.c.l.bf16 %v1009_v26 }
  0x5a   :  { %414 = vadd.xlane.f32.xlu0 %v1317_v18  ;;  %416 = vadd.xlane.f32.xlu1 %v1319_v27  ;;  %v238_v45 = vadd.f32 %v971_v25, %v142_v35  ;;  %v143_v46 = vmul.f32 11.313708, %v908_v36  ;;  %v975_v47 = vunpack.c.l.bf16 %v1024_v33  ;;  %v280_v48 = vunpack.c.2.s8 %v258_v17 }
  0x5b   :  { %v1325_v50 = vmul.f32 %v341_v39, %v237_v29  ;;  %v342_v51 = vmul.f32 1.4285715, %v310_v41  ;;  %v311_v52 = vcvt.s32.f32 %v279_v43  ;;  %v144_v53 = vmul.f32 11.313708, %v911_v44  ;;  %v1027_v41 = vld [vmem:[#allocation5 + $0x60] sm:$0xff]  }
  0x5c   :  { %v239_v58 = vadd.f32 %v972_v38, %v143_v46  ;;  %v312_v59 = vcvt.s32.f32 %v280_v48  ;;  %v912_v60 = vunpack.c.h.bf16 %v1009_v26  ;;  %v976_v61 = vunpack.c.h.bf16 %v1024_v33  ;;  %v1012_v33 = vld [vmem:[#allocation2 + $0x60] sm:$0xff]  }
  0x5d   :  { %v1329_v63 = vmul.f32 %v342_v51, %v238_v45  ;;  %v343_v0 = vmul.f32 1.4285715, %v311_v52  ;;  %v240_v2 = vadd.f32 %v975_v47, %v144_v53  ;;  %v281_v3 = vunpack.c.3.s8 %v258_v17  ;;  %v260_v47 = vld [vmem:[#allocation7 + $0x30] sm:$0xff] }
  0x5e   :  { %418 = vadd.xlane.f32.xlu0 %v1322_v34  ;;  %420 = vadd.xlane.f32.xlu1 %v1325_v50  ;;  %v344_v4 = vmul.f32 1.4285715, %v312_v59  ;;  %v145_v6 = vmul.f32 11.313708, %v912_v60  ;;  %v915_v7 = vunpack.c.l.bf16 %v1010_v55  ;;  %v979_v8 = vunpack.c.l.bf16 %v1025_v57 }
  0x5f   :  { %v1331_v10 = vmul.f32 %v343_v0, %v239_v58  ;;  %v313_v11 = vcvt.s32.f32 %v281_v3  ;;  %v282_v12 = vunpack.c.0.s8 %v259_v62  ;;  %v916_v13 = vunpack.c.h.bf16 %v1010_v55  ;;  %v1013_v3 = vld [vmem:[#allocation2 + $0x68] sm:$0xff]  }
  0x60   :  { %v1334_v19 = vmul.f32 %v344_v4, %v240_v2  ;;  %v241_v20 = vadd.f32 %v976_v61, %v145_v6  ;;  %v146_v21 = vmul.f32 11.313708, %v915_v7  ;;  %v980_v22 = vunpack.c.h.bf16 %v1025_v57  ;;  %v1028_v4 = vld [vmem:[#allocation5 + $0x68] sm:$0xff]  }
  0x61   :  { %v345_v17 = vmul.f32 1.4285715, %v313_v11  ;;  %v314_v23 = vcvt.s32.f32 %v282_v12  ;;  %v147_v24 = vmul.f32 11.313708, %v916_v13  ;;  %v283_v25 = vunpack.c.1.s8 %v259_v62 }
  0x62   :  { %422 = vadd.xlane.f32.xlu0 %v1329_v63  ;;  %424 = vadd.xlane.f32.xlu1 %v1331_v10  ;;  %v242_v26 = vadd.f32 %v979_v8, %v146_v21  ;;  %v919_v29 = vunpack.c.l.bf16 %v1011_v14  ;;  %v983_v30 = vunpack.c.l.bf16 %v1026_v16  ;;  %v284_v31 = vunpack.c.2.s8 %v259_v62 }
  0x63   :  { %v1337_v35 = vmul.f32 %v345_v17, %v241_v20  ;;  %v346_v36 = vmul.f32 1.4285715, %v314_v23  ;;  %v243_v38 = vadd.f32 %v980_v22, %v147_v24  ;;  %v315_v39 = vcvt.s32.f32 %v283_v25 }
  0x64   :  { %v148_v43 = vmul.f32 11.313708, %v919_v29  ;;  %v316_v44 = vcvt.s32.f32 %v284_v31  ;;  %v920_v45 = vunpack.c.h.bf16 %v1011_v14  ;;  %v984_v46 = vunpack.c.h.bf16 %v1026_v16  ;;  %v1029_v29 = vld [vmem:[#allocation5 + $0x70] sm:$0xff]  }
  0x65   :  { %v1341_v48 = vmul.f32 %v346_v36, %v242_v26  ;;  %v347_v51 = vmul.f32 1.4285715, %v315_v39  ;;  %v285_v52 = vunpack.c.3.s8 %v259_v62  ;;  %v923_v53 = vunpack.c.l.bf16 %v1012_v33  ;;  %v1014_v26 = vld [vmem:[#allocation2 + $0x70] sm:$0xff]  }
  0x66   :  { %426 = vadd.xlane.f32.xlu0 %v1334_v19  ;;  %428 = vadd.xlane.f32.xlu1 %v1337_v35  ;;  %v244_v55 = vadd.f32 %v983_v30, %v148_v43  ;;  %v348_v57 = vmul.f32 1.4285715, %v316_v44  ;;  %v149_v58 = vmul.f32 11.313708, %v920_v45  ;;  %v987_v59 = vunpack.c.l.bf16 %v1027_v41 }
  0x67   :  { %v1343_v60 = vmul.f32 %v347_v51, %v243_v38  ;;  %v317_v61 = vcvt.s32.f32 %v285_v52  ;;  %v150_v0 = vmul.f32 11.313708, %v923_v53  ;;  %v286_v2 = vunpack.c.0.s8 %v260_v47  ;;  %v261_v38 = vld [vmem:[#allocation7 + $0x38] sm:$0xff] }
  0x68   :  { %v1346_v6 = vmul.f32 %v348_v57, %v244_v55  ;;  %v245_v7 = vadd.f32 %v984_v46, %v149_v58  ;;  %v924_v8 = vunpack.c.h.bf16 %v1012_v33  ;;  %v988_v11 = vunpack.c.h.bf16 %v1027_v41  ;;  %v1015_v53 = vld [vmem:[#allocation2 + $0x78] sm:$0xff]  }
  0x69   :  { %v349_v62 = vmul.f32 1.4285715, %v317_v61  ;;  %v246_v12 = vadd.f32 %v987_v59, %v150_v0  ;;  %v318_v13 = vcvt.s32.f32 %v286_v2  ;;  %v287_v14 = vunpack.c.1.s8 %v260_v47  ;;  %v1030_v61 = vld [vmem:[#allocation5 + $0x78] sm:$0xff]  }
  0x6a   :  { %430 = vadd.xlane.f32.xlu0 %v1341_v48  ;;  %432 = vadd.xlane.f32.xlu1 %v1343_v60  ;;  %v151_v16 = vmul.f32 11.313708, %v924_v8  ;;  %v927_v20 = vunpack.c.l.bf16 %v1013_v3  ;;  %v991_v21 = vunpack.c.l.bf16 %v1028_v4  ;;  %v288_v22 = vunpack.c.2.s8 %v260_v47 }
  0x6b   :  { %v1349_v17 = vmul.f32 %v349_v62, %v245_v7  ;;  %v350_v23 = vmul.f32 1.4285715, %v318_v13  ;;  %v319_v24 = vcvt.s32.f32 %v287_v14  ;;  %v928_v25 = vunpack.c.h.bf16 %v1013_v3 }
  0x6c   :  { %v247_v30 = vadd.f32 %v988_v11, %v151_v16  ;;  %v152_v31 = vmul.f32 11.313708, %v927_v20  ;;  %v320_v33 = vcvt.s32.f32 %v288_v22  ;;  %v992_v36 = vunpack.c.h.bf16 %v1028_v4 }
  0x6d   :  { %v1353_v39 = vmul.f32 %v350_v23, %v246_v12  ;;  %v351_v41 = vmul.f32 1.4285715, %v319_v24  ;;  %v153_v43 = vmul.f32 11.313708, %v928_v25  ;;  %v289_v44 = vunpack.c.3.s8 %v260_v47 }
  0x6e   :  { %434 = vadd.xlane.f32.xlu0 %v1346_v6  ;;  %436 = vadd.xlane.f32.xlu1 %v1349_v17  ;;  %v248_v45 = vadd.f32 %v991_v21, %v152_v31  ;;  %v352_v46 = vmul.f32 1.4285715, %v320_v33  ;;  %v931_v51 = vunpack.c.l.bf16 %v1014_v26  ;;  %v995_v52 = vunpack.c.l.bf16 %v1029_v29 }
  0x6f   :  { %v1355_v55 = vmul.f32 %v351_v41, %v247_v30  ;;  %v249_v57 = vadd.f32 %v992_v36, %v153_v43  ;;  %v321_v58 = vcvt.s32.f32 %v289_v44  ;;  %v290_v59 = vunpack.c.0.s8 %v261_v38 }
  0x70   :  { %v1358_v0 = vmul.f32 %v352_v46, %v248_v45  ;;  %v154_v2 = vmul.f32 11.313708, %v931_v51  ;;  %v932_v3 = vunpack.c.h.bf16 %v1014_v26  ;;  %v996_v4 = vunpack.c.h.bf16 %v1029_v29 }
  0x71   :  { %v353_v47 = vmul.f32 1.4285715, %v321_v58  ;;  %v322_v7 = vcvt.s32.f32 %v290_v59  ;;  %v291_v8 = vunpack.c.1.s8 %v261_v38  ;;  %v935_v11 = vunpack.c.l.bf16 %v1015_v53 }
  0x72   :  { %438 = vadd.xlane.f32.xlu0 %v1353_v39  ;;  %440 = vadd.xlane.f32.xlu1 %v1355_v55  ;;  %v250_v62 = vadd.f32 %v995_v52, %v154_v2  ;;  %v155_v12 = vmul.f32 11.313708, %v932_v3  ;;  %v999_v13 = vunpack.c.l.bf16 %v1030_v61  ;;  %v292_v14 = vunpack.c.2.s8 %v261_v38 }
  0x73   :  { %v1361_v16 = vmul.f32 %v353_v47, %v249_v57  ;;  %v354_v20 = vmul.f32 1.4285715, %v322_v7  ;;  %v323_v21 = vcvt.s32.f32 %v291_v8  ;;  %v156_v22 = vmul.f32 11.313708, %v935_v11 }
  0x74   :  { %v251_v23 = vadd.f32 %v996_v4, %v155_v12  ;;  %v324_v24 = vcvt.s32.f32 %v292_v14  ;;  %v936_v25 = vunpack.c.h.bf16 %v1015_v53  ;;  %v1000_v26 = vunpack.c.h.bf16 %v1030_v61 }
  0x75   :  { %v1365_v29 = vmul.f32 %v354_v20, %v250_v62  ;;  %v355_v30 = vmul.f32 1.4285715, %v323_v21  ;;  %v252_v31 = vadd.f32 %v999_v13, %v156_v22  ;;  %v293_v33 = vunpack.c.3.s8 %v261_v38 }
  0x76   :  { %442 = vadd.xlane.f32.xlu0 %v1358_v0  ;;  %444 = vadd.xlane.f32.xlu1 %v1361_v16  ;;  %v356_v36 = vmul.f32 1.4285715, %v324_v24  ;;  %v157_v41 = vmul.f32 11.313708, %v936_v25 }
  0x77   :  { %v1367_v43 = vmul.f32 %v355_v30, %v251_v23  ;;  %v325_v44 = vcvt.s32.f32 %v293_v33 }
  0x78   :  { %v1370_v45 = vmul.f32 %v356_v36, %v252_v31  ;;  %v253_v46 = vadd.f32 %v1000_v26, %v157_v41 }
  0x79   :  { %v357_v51 = vmul.f32 1.4285715, %v325_v44 }
  0x7a   :  { %446 = vadd.xlane.f32.xlu0 %v1365_v29  ;;  %448 = vadd.xlane.f32.xlu1 %v1367_v43 }
  0x7b   :  { %v1373_v52 = vmul.f32 %v357_v51, %v253_v46 }
  0x7e   :  { %450 = vadd.xlane.f32.xlu0 %v1370_v45  ;;  %452 = vadd.xlane.f32.xlu1 %v1373_v52 }
  0xcf   :  { %v391_v38 = vpop.xlane.xlu0 %390  ;;  %v395_v57 = vpop.xlane.xlu1 %394 }
  0xd0   :  { %v455_v53 = vmul.f32 0.0078125, %v391_v38  ;;  %v457_v58 = vmul.f32 0.0078125, %v395_v57 }
  0xd2   :  { %v1378_v59 = vsub.f32 %v1281_v32, %v455_v53  ;;  %v1381_v61 = vsub.f32 %v1283_v37, %v457_v58 }
  0xd3   :  { %v393_v2 = vpop.xlane.xlu0 %392  ;;  %v397_v47 = vpop.xlane.xlu1 %396 }
  0xd4   :  { %v456_v3 = vmul.f32 0.0078125, %v393_v2  ;;  %v519_v4 = vmul.f32 %v1378_v59, %v1378_v59  ;;  %v458_v7 = vmul.f32 0.0078125, %v397_v47  ;;  %v521_v11 = vmul.f32 %v1381_v61, %v1381_v61 }
  0xd6   :  { %v1386_v8 = vsub.f32 %v1286_v42, %v456_v3  ;;  %551 = vadd.xlane.f32.xlu0 %v519_v4  ;;  %v1391_v32 = vsub.f32 %v1289_v54, %v458_v7 }
  0xd7   :  { %v399_v62 = vpop.xlane.xlu0 %398  ;;  %v401_v13 = vpop.xlane.xlu1 %400 }
  0xd8   :  { %v459_v37 = vmul.f32 0.0078125, %v399_v62  ;;  %v520_v12 = vmul.f32 %v1386_v8, %v1386_v8  ;;  %v460_v14 = vmul.f32 0.0078125, %v401_v13  ;;  %v522_v42 = vmul.f32 %v1391_v32, %v1391_v32 }
  0xda   :  { %v1396_v20 = vsub.f32 %v1293_v1, %v459_v37  ;;  %555 = vadd.xlane.f32.xlu0 %v521_v11  ;;  %553 = vadd.xlane.f32.xlu1 %v520_v12  ;;  %v1401_v21 = vsub.f32 %v1295_v9, %v460_v14 }
  0xdb   :  { %v403_v54 = vpop.xlane.xlu0 %402  ;;  %v405_v24 = vpop.xlane.xlu1 %404 }
  0xdc   :  { %v461_v22 = vmul.f32 0.0078125, %v403_v54  ;;  %v523_v23 = vmul.f32 %v1396_v20, %v1396_v20  ;;  %v462_v25 = vmul.f32 0.0078125, %v405_v24  ;;  %v524_v1 = vmul.f32 %v1401_v21, %v1401_v21 }
  0xde   :  { %v1406_v26 = vsub.f32 %v1298_v15, %v461_v22  ;;  %557 = vadd.xlane.f32.xlu1 %v522_v42  ;;  %559 = vadd.xlane.f32.xlu0 %v523_v23  ;;  %v1411_v30 = vsub.f32 %v1301_v28, %v462_v25 }
  0xdf   :  { %v407_v9 = vpop.xlane.xlu0 %406  ;;  %v409_v36 = vpop.xlane.xlu1 %408 }
  0xe0   :  { %v463_v31 = vmul.f32 0.0078125, %v407_v9  ;;  %v525_v33 = vmul.f32 %v1406_v26, %v1406_v26  ;;  %v464_v41 = vmul.f32 0.0078125, %v409_v36  ;;  %v526_v15 = vmul.f32 %v1411_v30, %v1411_v30 }
  0xe2   :  { %v1416_v44 = vsub.f32 %v1305_v40, %v463_v31  ;;  %561 = vadd.xlane.f32.xlu1 %v524_v1  ;;  %563 = vadd.xlane.f32.xlu0 %v525_v33  ;;  %v1421_v46 = vsub.f32 %v1307_v49, %v464_v41 }
  0xe3   :  { %v411_v28 = vpop.xlane.xlu0 %410  ;;  %v413_v53 = vpop.xlane.xlu1 %412 }
  0xe4   :  { %v465_v51 = vmul.f32 0.0078125, %v411_v28  ;;  %v527_v38 = vmul.f32 %v1416_v44, %v1416_v44  ;;  %v466_v57 = vmul.f32 0.0078125, %v413_v53  ;;  %v528_v40 = vmul.f32 %v1421_v46, %v1421_v46 }
  0xe6   :  { %v1426_v58 = vsub.f32 %v1310_v56, %v465_v51  ;;  %565 = vadd.xlane.f32.xlu1 %v526_v15  ;;  %567 = vadd.xlane.f32.xlu0 %v527_v38  ;;  %v1431_v2 = vsub.f32 %v1313_v5, %v466_v57 }
  0xe7   :  { %v415_v49 = vpop.xlane.xlu0 %414  ;;  %v417_v47 = vpop.xlane.xlu1 %416 }
  0xe8   :  { %v467_v3 = vmul.f32 0.0078125, %v415_v49  ;;  %v529_v4 = vmul.f32 %v1426_v58, %v1426_v58  ;;  %v468_v7 = vmul.f32 0.0078125, %v417_v47  ;;  %v530_v56 = vmul.f32 %v1431_v2, %v1431_v2 }
  0xea   :  { %v1436_v11 = vsub.f32 %v1317_v18, %v467_v3  ;;  %569 = vadd.xlane.f32.xlu1 %v528_v40  ;;  %571 = vadd.xlane.f32.xlu0 %v529_v4  ;;  %v1441_v62 = vsub.f32 %v1319_v27, %v468_v7 }
  0xeb   :  { %v419_v5 = vpop.xlane.xlu0 %418  ;;  %v421_v13 = vpop.xlane.xlu1 %420 }
  0xec   :  { %v469_v37 = vmul.f32 0.0078125, %v419_v5  ;;  %v531_v12 = vmul.f32 %v1436_v11, %v1436_v11  ;;  %v470_v14 = vmul.f32 0.0078125, %v421_v13  ;;  %v532_v18 = vmul.f32 %v1441_v62, %v1441_v62 }
  0xee   :  { %v1446_v42 = vsub.f32 %v1322_v34, %v469_v37  ;;  %573 = vadd.xlane.f32.xlu1 %v530_v56  ;;  %575 = vadd.xlane.f32.xlu0 %v531_v12  ;;  %v1451_v54 = vsub.f32 %v1325_v50, %v470_v14 }
  0xef   :  { %v423_v27 = vpop.xlane.xlu0 %422  ;;  %v425_v24 = vpop.xlane.xlu1 %424 }
  0xf0   :  { %v471_v22 = vmul.f32 0.0078125, %v423_v27  ;;  %v533_v23 = vmul.f32 %v1446_v42, %v1446_v42  ;;  %v472_v25 = vmul.f32 0.0078125, %v425_v24  ;;  %v534_v34 = vmul.f32 %v1451_v54, %v1451_v54 }
  0xf2   :  { %v1456_v1 = vsub.f32 %v1329_v63, %v471_v22  ;;  %577 = vadd.xlane.f32.xlu1 %v532_v18  ;;  %579 = vadd.xlane.f32.xlu0 %v533_v23  ;;  %v1461_v9 = vsub.f32 %v1331_v10, %v472_v25 }
  0xf3   :  { %v427_v50 = vpop.xlane.xlu0 %426  ;;  %v429_v36 = vpop.xlane.xlu1 %428 }
  0xf4   :  { %v473_v31 = vmul.f32 0.0078125, %v427_v50  ;;  %v535_v33 = vmul.f32 %v1456_v1, %v1456_v1  ;;  %v474_v41 = vmul.f32 0.0078125, %v429_v36  ;;  %v536_v63 = vmul.f32 %v1461_v9, %v1461_v9 }
  0xf6   :  { %v1466_v15 = vsub.f32 %v1334_v19, %v473_v31  ;;  %581 = vadd.xlane.f32.xlu1 %v534_v34  ;;  %583 = vadd.xlane.f32.xlu0 %v535_v33  ;;  %v1471_v28 = vsub.f32 %v1337_v35, %v474_v41 }
  0xf7   :  { %v431_v10 = vpop.xlane.xlu0 %430  ;;  %v433_v53 = vpop.xlane.xlu1 %432 }
  0xf8   :  { %v475_v51 = vmul.f32 0.0078125, %v431_v10  ;;  %v537_v38 = vmul.f32 %v1466_v15, %v1466_v15  ;;  %v476_v57 = vmul.f32 0.0078125, %v433_v53  ;;  %v538_v19 = vmul.f32 %v1471_v28, %v1471_v28 }
  0xfa   :  { %v1476_v40 = vsub.f32 %v1341_v48, %v475_v51  ;;  %585 = vadd.xlane.f32.xlu1 %v536_v63  ;;  %587 = vadd.xlane.f32.xlu0 %v537_v38  ;;  %v1481_v49 = vsub.f32 %v1343_v60, %v476_v57 }
  0xfb   :  { %v435_v35 = vpop.xlane.xlu0 %434  ;;  %v437_v47 = vpop.xlane.xlu1 %436 }
  0xfc   :  { %v477_v3 = vmul.f32 0.0078125, %v435_v35  ;;  %v539_v4 = vmul.f32 %v1476_v40, %v1476_v40  ;;  %v478_v7 = vmul.f32 0.0078125, %v437_v47  ;;  %v540_v48 = vmul.f32 %v1481_v49, %v1481_v49 }
  0xfe   :  { %v1486_v56 = vsub.f32 %v1346_v6, %v477_v3  ;;  %589 = vadd.xlane.f32.xlu1 %v538_v19  ;;  %591 = vadd.xlane.f32.xlu0 %v539_v4  ;;  %v1491_v5 = vsub.f32 %v1349_v17, %v478_v7 }
  0xff   :  { %v439_v60 = vpop.xlane.xlu0 %438  ;;  %v441_v13 = vpop.xlane.xlu1 %440 }
 0x100   :  { %v479_v37 = vmul.f32 0.0078125, %v439_v60  ;;  %v541_v12 = vmul.f32 %v1486_v56, %v1486_v56  ;;  %v480_v14 = vmul.f32 0.0078125, %v441_v13  ;;  %v542_v6 = vmul.f32 %v1491_v5, %v1491_v5 }
 0x102   :  { %v1496_v18 = vsub.f32 %v1353_v39, %v479_v37  ;;  %593 = vadd.xlane.f32.xlu1 %v540_v48  ;;  %595 = vadd.xlane.f32.xlu0 %v541_v12  ;;  %v1501_v27 = vsub.f32 %v1355_v55, %v480_v14 }
 0x103   :  { %v443_v17 = vpop.xlane.xlu0 %442  ;;  %v445_v24 = vpop.xlane.xlu1 %444 }
 0x104   :  { %v481_v22 = vmul.f32 0.0078125, %v443_v17  ;;  %v543_v23 = vmul.f32 %v1496_v18, %v1496_v18  ;;  %v482_v25 = vmul.f32 0.0078125, %v445_v24  ;;  %v544_v39 = vmul.f32 %v1501_v27, %v1501_v27 }
 0x106   :  { %v1506_v34 = vsub.f32 %v1358_v0, %v481_v22  ;;  %597 = vadd.xlane.f32.xlu1 %v542_v6  ;;  %599 = vadd.xlane.f32.xlu0 %v543_v23  ;;  %v1511_v50 = vsub.f32 %v1361_v16, %v482_v25 }
 0x107   :  { %v447_v55 = vpop.xlane.xlu0 %446  ;;  %v449_v36 = vpop.xlane.xlu1 %448 }
 0x108   :  { %v483_v31 = vmul.f32 0.0078125, %v447_v55  ;;  %v545_v33 = vmul.f32 %v1506_v34, %v1506_v34  ;;  %v484_v41 = vmul.f32 0.0078125, %v449_v36  ;;  %v546_v0 = vmul.f32 %v1511_v50, %v1511_v50 }
 0x10a   :  { %v1516_v63 = vsub.f32 %v1365_v29, %v483_v31  ;;  %601 = vadd.xlane.f32.xlu1 %v544_v39  ;;  %603 = vadd.xlane.f32.xlu0 %v545_v33  ;;  %v1521_v10 = vsub.f32 %v1367_v43, %v484_v41  ;;  %v1540_v33 = vld [vmem:[%s1661_s3] ss:$0 sm:$0xff]  ;;  %s1204_s3 = smov [#allocation8]  }
 0x10b   :  { %v451_v16 = vpop.xlane.xlu0 %450  ;;  %v453_v53 = vpop.xlane.xlu1 %452 }
 0x10c   :  { %v485_v51 = vmul.f32 0.0078125, %v451_v16  ;;  %v547_v38 = vmul.f32 %v1516_v63, %v1516_v63  ;;  %v486_v57 = vmul.f32 0.0078125, %v453_v53  ;;  %v548_v29 = vmul.f32 %v1521_v10, %v1521_v10 }
 0x10e   :  { %v1526_v19 = vsub.f32 %v1370_v45, %v485_v51  ;;  %605 = vadd.xlane.f32.xlu1 %v546_v0  ;;  %607 = vadd.xlane.f32.xlu0 %v547_v38  ;;  %v1531_v35 = vsub.f32 %v1373_v52, %v486_v57  ;;  %v1546_v38 = vld [vmem:[%s1662_s4] ss:$0 sm:$0xff]  ;;  %s858_s4 = sshll.u32 %s1204_s3, 4  ;;  %s859_s4 = int_to_ptr.vmem [resolvable:$true] %s858_s4 }
 0x10f   :  { %s1169_s9 = scalar_lea.vmem %s859_s4, 4096  ;;  %p1174_p11 = scmp.lt.s32.totalorder %s859_s4, %s859_s4 }
 0x110   :  { %v549_v43 = vmul.f32 %v1526_v19, %v1526_v19  ;;  %v550_v3 = vmul.f32 %v1531_v35, %v1531_v35  ;;  %p1170_p10 = scmp.ne.s32.totalorder %s859_s4, %s1169_s9  ;;  %p1175_p12 = scmp.lt.s32.totalorder %s1169_s9, %s1169_s9 }
 0x112   :  { %609 = vadd.xlane.f32.xlu1 %v548_v29  ;;  %611 = vadd.xlane.f32.xlu0 %v549_v43  ;;  %p1176_p13 = por %p1175_p12, %p1174_p11 }
 0x114   :  { %p1177_p0 = pnand %p1176_p13, %p1170_p10 }
 0x116   :  { %613 = vadd.xlane.f32.xlu1 %v550_v3 }
 0x163   :  { %v552_v4 = vpop.xlane.xlu0 %551 }
 0x164   :  { %v615_v45 = vmul.f32 0.0078125, %v552_v4 }
 0x166   :  { %v647_v47 = vadd.f32 1e-05, %v615_v45 }
 0x167   :  { %v554_v7 = vpop.xlane.xlu1 %553  ;;  %v556_v48 = vpop.xlane.xlu0 %555 }
 0x168   :  { %1039 = vrsqrt.f32 %v647_v47  ;;  %v616_v60 = vmul.f32 0.0078125, %v554_v7  ;;  %v617_v37 = vmul.f32 0.0078125, %v556_v48 }
 0x16a   :  { %v648_v12 = vadd.f32 1e-05, %v616_v60  ;;  %v649_v52 = vadd.f32 1e-05, %v617_v37 }
 0x16b   :  { %v558_v13 = vpop.xlane.xlu1 %557  ;;  %v560_v14 = vpop.xlane.xlu0 %559 }
 0x16c   :  { %1041 = vrsqrt.f32 %v648_v12  ;;  %v618_v6 = vmul.f32 0.0078125, %v558_v13  ;;  %v619_v17 = vmul.f32 0.0078125, %v560_v14 }
 0x16d   :  { %1043 = vrsqrt.f32 %v649_v52 }
 0x16e   :  { %v650_v22 = vadd.f32 1e-05, %v618_v6  ;;  %v651_v23 = vadd.f32 1e-05, %v619_v17 }
 0x16f   :  { %v562_v24 = vpop.xlane.xlu1 %561  ;;  %v564_v25 = vpop.xlane.xlu0 %563 }
 0x170   :  { %1045 = vrsqrt.f32 %v650_v22  ;;  %v620_v39 = vmul.f32 0.0078125, %v562_v24  ;;  %v621_v55 = vmul.f32 0.0078125, %v564_v25 }
 0x171   :  { %1047 = vrsqrt.f32 %v651_v23 }
 0x172   :  { %v1040_v31 = vpop.eup %1039  ;;  %v652_v36 = vadd.f32 1e-05, %v620_v39  ;;  %v653_v41 = vadd.f32 1e-05, %v621_v55 }
 0x173   :  { %v711_v0 = vmul.f32 %v1040_v31, %v1378_v59  ;;  %v566_v16 = vpop.xlane.xlu1 %565  ;;  %v568_v51 = vpop.xlane.xlu0 %567 }
 0x174   :  { %1049 = vrsqrt.f32 %v652_v36  ;;  %v622_v53 = vmul.f32 0.0078125, %v566_v16  ;;  %v623_v57 = vmul.f32 0.0078125, %v568_v51 }
 0x175   :  { %v750_v29 = vmul.f32 %v1540_v33, %v711_v0  ;;  %1051 = vrsqrt.f32 %v653_v41 }
 0x176   :  { %v1042_v43 = vpop.eup %1041  ;;  %v654_v3 = vadd.f32 1e-05, %v622_v53  ;;  %v655_v4 = vadd.f32 1e-05, %v623_v57 }
 0x177   :  { %v1044_v45 = vpop.eup %1043  ;;  %v789_v47 = vadd.f32 %v1546_v38, %v750_v29  ;;  %v712_v59 = vmul.f32 %v1042_v43, %v1386_v8  ;;  %v570_v7 = vpop.xlane.xlu1 %569 }
 0x178   :  { %v572_v48 = vpop.xlane.xlu0 %571  ;;  %v713_v60 = vmul.f32 %v1044_v45, %v1381_v61  ;;  %1053 = vrsqrt.f32 %v654_v3  ;;  %v624_v37 = vmul.f32 0.0078125, %v570_v7 }
 0x179   :  { %v625_v12 = vmul.f32 0.0078125, %v572_v48  ;;  %821 = vst [vmem:[#allocation8] sm:$0xff] %v789_v47  ;;  %v751_v52 = vmul.f32 %v1540_v33, %v712_v59  ;;  %1055 = vrsqrt.f32 %v655_v4 }
 0x17a   :  { %v1046_v13 = vpop.eup %1045  ;;  %v752_v14 = vmul.f32 %v1540_v33, %v713_v60  ;;  %v656_v6 = vadd.f32 1e-05, %v624_v37 }
 0x17b   :  { %v657_v17 = vadd.f32 1e-05, %v625_v12  ;;  %v1048_v22 = vpop.eup %1047  ;;  %v790_v23 = vadd.f32 %v1546_v38, %v751_v52  ;;  %v714_v8 = vmul.f32 %v1046_v13, %v1391_v32  ;;  %v574_v24 = vpop.xlane.xlu1 %573 }
 0x17c   :  { %v576_v25 = vpop.xlane.xlu0 %575  ;;  %v791_v61 = vadd.f32 %v1546_v38, %v752_v14  ;;  %v715_v39 = vmul.f32 %v1048_v22, %v1396_v20  ;;  %1057 = vrsqrt.f32 %v656_v6  ;;  %v626_v55 = vmul.f32 0.0078125, %v574_v24 }
 0x17d   :  { %822 = vst [vmem:[#allocation8 + $0x8] sm:$0xff] %v790_v23  ;;  %v753_v31 = vmul.f32 %v1540_v33, %v714_v8  ;;  %1059 = vrsqrt.f32 %v657_v17  ;;  %v627_v36 = vmul.f32 0.0078125, %v576_v25 }
 0x17e   :  { %v1050_v41 = vpop.eup %1049  ;;  %823 = vst [vmem:[#allocation8 + $0x10] sm:$0xff] %v791_v61  ;;  %v754_v0 = vmul.f32 %v1540_v33, %v715_v39  ;;  %v658_v16 = vadd.f32 1e-05, %v626_v55 }
 0x17f   :  { %v1052_v51 = vpop.eup %1051  ;;  %v792_v32 = vadd.f32 %v1546_v38, %v753_v31  ;;  %v716_v53 = vmul.f32 %v1050_v41, %v1401_v21  ;;  %v659_v57 = vadd.f32 1e-05, %v627_v36  ;;  %v578_v29 = vpop.xlane.xlu1 %577 }
 0x180   :  { %v580_v20 = vpop.xlane.xlu0 %579  ;;  %v793_v43 = vadd.f32 %v1546_v38, %v754_v0  ;;  %v717_v3 = vmul.f32 %v1052_v51, %v1406_v26  ;;  %1061 = vrsqrt.f32 %v658_v16  ;;  %v628_v4 = vmul.f32 0.0078125, %v578_v29 }
 0x181   :  { %824 = vst [vmem:[#allocation8 + $0x18] sm:$0xff] %v792_v32  ;;  %v755_v45 = vmul.f32 %v1540_v33, %v716_v53  ;;  %1063 = vrsqrt.f32 %v659_v57  ;;  %v629_v47 = vmul.f32 0.0078125, %v580_v20 }
 0x182   :  { %v1054_v59 = vpop.eup %1053  ;;  %825 = vst [vmem:[#allocation8 + $0x20] sm:$0xff] %v793_v43  ;;  %v756_v7 = vmul.f32 %v1540_v33, %v717_v3  ;;  %v660_v48 = vadd.f32 1e-05, %v628_v4 }
 0x183   :  { %v1056_v21 = vpop.eup %1055  ;;  %v794_v60 = vadd.f32 %v1546_v38, %v755_v45  ;;  %v718_v37 = vmul.f32 %v1054_v59, %v1411_v30  ;;  %v661_v12 = vadd.f32 1e-05, %v629_v47  ;;  %v582_v52 = vpop.xlane.xlu1 %581 }
 0x184   :  { %v584_v26 = vpop.xlane.xlu0 %583  ;;  %v795_v13 = vadd.f32 %v1546_v38, %v756_v7  ;;  %v719_v14 = vmul.f32 %v1056_v21, %v1416_v44  ;;  %1065 = vrsqrt.f32 %v660_v48  ;;  %v630_v6 = vmul.f32 0.0078125, %v582_v52 }
 0x185   :  { %826 = vst [vmem:[#allocation8 + $0x28] sm:$0xff] %v794_v60  ;;  %v757_v17 = vmul.f32 %v1540_v33, %v718_v37  ;;  %1067 = vrsqrt.f32 %v661_v12  ;;  %v631_v22 = vmul.f32 0.0078125, %v584_v26 }
 0x186   :  { %v1058_v23 = vpop.eup %1057  ;;  %827 = vst [vmem:[#allocation8 + $0x30] sm:$0xff] %v795_v13  ;;  %v758_v8 = vmul.f32 %v1540_v33, %v719_v14  ;;  %v662_v24 = vadd.f32 1e-05, %v630_v6 }
 0x187   :  { %v1060_v30 = vpop.eup %1059  ;;  %v796_v25 = vadd.f32 %v1546_v38, %v757_v17  ;;  %v720_v61 = vmul.f32 %v1058_v23, %v1421_v46  ;;  %v663_v39 = vadd.f32 1e-05, %v631_v22  ;;  %v586_v55 = vpop.xlane.xlu1 %585 }
 0x188   :  { %v588_v44 = vpop.xlane.xlu0 %587  ;;  %v797_v31 = vadd.f32 %v1546_v38, %v758_v8  ;;  %v721_v36 = vmul.f32 %v1060_v30, %v1426_v58  ;;  %1069 = vrsqrt.f32 %v662_v24  ;;  %v632_v41 = vmul.f32 0.0078125, %v586_v55 }
 0x189   :  { %828 = vst [vmem:[#allocation8 + $0x38] sm:$0xff] %v796_v25  ;;  %v759_v0 = vmul.f32 %v1540_v33, %v720_v61  ;;  %1071 = vrsqrt.f32 %v663_v39  ;;  %v633_v16 = vmul.f32 0.0078125, %v588_v44 }
 0x18a   :  { %v1062_v51 = vpop.eup %1061  ;;  %829 = vst [vmem:[#allocation8 + $0x40] sm:$0xff] %v797_v31  ;;  %v760_v32 = vmul.f32 %v1540_v33, %v721_v36  ;;  %v664_v53 = vadd.f32 1e-05, %v632_v41 }
 0x18b   :  { %v1064_v46 = vpop.eup %1063  ;;  %v798_v57 = vadd.f32 %v1546_v38, %v759_v0  ;;  %v722_v29 = vmul.f32 %v1062_v51, %v1431_v2  ;;  %v665_v20 = vadd.f32 1e-05, %v633_v16  ;;  %v590_v43 = vpop.xlane.xlu1 %589 }
 0x18c   :  { %v592_v58 = vpop.xlane.xlu0 %591  ;;  %v799_v3 = vadd.f32 %v1546_v38, %v760_v32  ;;  %v723_v4 = vmul.f32 %v1064_v46, %v1436_v11  ;;  %1073 = vrsqrt.f32 %v664_v53  ;;  %v634_v45 = vmul.f32 0.0078125, %v590_v43 }
 0x18d   :  { %830 = vst [vmem:[#allocation8 + $0x48] sm:$0xff] %v798_v57  ;;  %v761_v47 = vmul.f32 %v1540_v33, %v722_v29  ;;  %1075 = vrsqrt.f32 %v665_v20  ;;  %v635_v59 = vmul.f32 0.0078125, %v592_v58 }
 0x18e   :  { %v1066_v7 = vpop.eup %1065  ;;  %831 = vst [vmem:[#allocation8 + $0x50] sm:$0xff] %v799_v3  ;;  %v762_v48 = vmul.f32 %v1540_v33, %v723_v4  ;;  %v666_v21 = vadd.f32 1e-05, %v634_v45 }
 0x18f   :  { %v1068_v2 = vpop.eup %1067  ;;  %v800_v60 = vadd.f32 %v1546_v38, %v761_v47  ;;  %v724_v37 = vmul.f32 %v1066_v7, %v1441_v62  ;;  %v667_v12 = vadd.f32 1e-05, %v635_v59  ;;  %v594_v52 = vpop.xlane.xlu1 %593 }
 0x190   :  { %v596_v11 = vpop.xlane.xlu0 %595  ;;  %v801_v26 = vadd.f32 %v1546_v38, %v762_v48  ;;  %v725_v13 = vmul.f32 %v1068_v2, %v1446_v42  ;;  %1077 = vrsqrt.f32 %v666_v21  ;;  %v636_v14 = vmul.f32 0.0078125, %v594_v52 }
 0x191   :  { %832 = vst [vmem:[#allocation8 + $0x58] sm:$0xff] %v800_v60  ;;  %v763_v6 = vmul.f32 %v1540_v33, %v724_v37  ;;  %1079 = vrsqrt.f32 %v667_v12  ;;  %v637_v17 = vmul.f32 0.0078125, %v596_v11 }
 0x192   :  { %v1070_v22 = vpop.eup %1069  ;;  %833 = vst [vmem:[#allocation8 + $0x60] sm:$0xff] %v801_v26  ;;  %v764_v23 = vmul.f32 %v1540_v33, %v725_v13  ;;  %v668_v8 = vadd.f32 1e-05, %v636_v14 }
 0x193   :  { %v1072_v62 = vpop.eup %1071  ;;  %v802_v24 = vadd.f32 %v1546_v38, %v763_v6  ;;  %v726_v30 = vmul.f32 %v1070_v22, %v1451_v54  ;;  %v669_v25 = vadd.f32 1e-05, %v637_v17  ;;  %v598_v61 = vpop.xlane.xlu1 %597 }
 0x194   :  { %v600_v42 = vpop.xlane.xlu0 %599  ;;  %v803_v39 = vadd.f32 %v1546_v38, %v764_v23  ;;  %v727_v55 = vmul.f32 %v1072_v62, %v1456_v1  ;;  %1081 = vrsqrt.f32 %v668_v8  ;;  %v638_v44 = vmul.f32 0.0078125, %v598_v61 }
 0x195   :  { %834 = vst [vmem:[#allocation8 + $0x68] sm:$0xff] %v802_v24  ;;  %v765_v31 = vmul.f32 %v1540_v33, %v726_v30  ;;  %1083 = vrsqrt.f32 %v669_v25  ;;  %v639_v36 = vmul.f32 0.0078125, %v600_v42 }
 0x196   :  { %v1074_v41 = vpop.eup %1073  ;;  %835 = vst [vmem:[#allocation8 + $0x70] sm:$0xff] %v803_v39  ;;  %v766_v0 = vmul.f32 %v1540_v33, %v727_v55  ;;  %v670_v16 = vadd.f32 1e-05, %v638_v44 }
 0x197   :  { %v1076_v54 = vpop.eup %1075  ;;  %v804_v51 = vadd.f32 %v1546_v38, %v765_v31  ;;  %v728_v32 = vmul.f32 %v1074_v41, %v1461_v9  ;;  %v671_v53 = vadd.f32 1e-05, %v639_v36  ;;  %v602_v46 = vpop.xlane.xlu1 %601 }
 0x198   :  { %v604_v1 = vpop.xlane.xlu0 %603  ;;  %v805_v57 = vadd.f32 %v1546_v38, %v766_v0  ;;  %v729_v29 = vmul.f32 %v1076_v54, %v1466_v15  ;;  %1085 = vrsqrt.f32 %v670_v16  ;;  %v640_v20 = vmul.f32 0.0078125, %v602_v46 }
 0x199   :  { %836 = vst [vmem:[#allocation8 + $0x78] sm:$0xff] %v804_v51  ;;  %v767_v43 = vmul.f32 %v1540_v33, %v728_v32  ;;  %1087 = vrsqrt.f32 %v671_v53  ;;  %v641_v58 = vmul.f32 0.0078125, %v604_v1 }
 0x19a   :  { %v1078_v3 = vpop.eup %1077  ;;  %837 = vst [vmem:[#allocation8 + $0x80] sm:$0xff] %v805_v57  ;;  %v768_v4 = vmul.f32 %v1540_v33, %v729_v29  ;;  %v672_v45 = vadd.f32 1e-05, %v640_v20 }
 0x19b   :  { %v1080_v9 = vpop.eup %1079  ;;  %v806_v47 = vadd.f32 %v1546_v38, %v767_v43  ;;  %v730_v59 = vmul.f32 %v1078_v3, %v1471_v28  ;;  %v673_v7 = vadd.f32 1e-05, %v641_v58  ;;  %v606_v48 = vpop.xlane.xlu1 %605 }
 0x19c   :  { %v608_v15 = vpop.xlane.xlu0 %607  ;;  %v807_v21 = vadd.f32 %v1546_v38, %v768_v4  ;;  %v731_v2 = vmul.f32 %v1080_v9, %v1476_v40  ;;  %1089 = vrsqrt.f32 %v672_v45  ;;  %v642_v60 = vmul.f32 0.0078125, %v606_v48 }
 0x19d   :  { %838 = vst [vmem:[#allocation8 + $0x88] sm:$0xff] %v806_v47  ;;  %v769_v37 = vmul.f32 %v1540_v33, %v730_v59  ;;  %1091 = vrsqrt.f32 %v673_v7  ;;  %v643_v12 = vmul.f32 0.0078125, %v608_v15 }
 0x19e   :  { %v1082_v52 = vpop.eup %1081  ;;  %839 = vst [vmem:[#allocation8 + $0x90] sm:$0xff] %v807_v21  ;;  %v770_v11 = vmul.f32 %v1540_v33, %v731_v2  ;;  %v674_v26 = vadd.f32 1e-05, %v642_v60 }
 0x19f   :  { %v1084_v28 = vpop.eup %1083  ;;  %v808_v13 = vadd.f32 %v1546_v38, %v769_v37  ;;  %v732_v14 = vmul.f32 %v1082_v52, %v1481_v49  ;;  %v675_v6 = vadd.f32 1e-05, %v643_v12  ;;  %v610_v17 = vpop.xlane.xlu1 %609 }
 0x1a0   :  { %v612_v40 = vpop.xlane.xlu0 %611  ;;  %v809_v22 = vadd.f32 %v1546_v38, %v770_v11  ;;  %v733_v23 = vmul.f32 %v1084_v28, %v1486_v56  ;;  %1093 = vrsqrt.f32 %v674_v26  ;;  %v644_v8 = vmul.f32 0.0078125, %v610_v17 }
 0x1a1   :  { %840 = vst [vmem:[#allocation8 + $0x98] sm:$0xff] %v808_v13  ;;  %v771_v62 = vmul.f32 %v1540_v33, %v732_v14  ;;  %1095 = vrsqrt.f32 %v675_v6  ;;  %v645_v24 = vmul.f32 0.0078125, %v612_v40 }
 0x1a2   :  { %v1086_v30 = vpop.eup %1085  ;;  %841 = vst [vmem:[#allocation8 + $0xa0] sm:$0xff] %v809_v22  ;;  %v772_v25 = vmul.f32 %v1540_v33, %v733_v23  ;;  %v676_v61 = vadd.f32 1e-05, %v644_v8 }
 0x1a3   :  { %v1088_v49 = vpop.eup %1087  ;;  %v810_v42 = vadd.f32 %v1546_v38, %v771_v62  ;;  %v734_v39 = vmul.f32 %v1086_v30, %v1491_v5  ;;  %v677_v55 = vadd.f32 1e-05, %v645_v24  ;;  %v614_v44 = vpop.xlane.xlu1 %613 }
 0x1a4   :  { %v811_v56 = vadd.f32 %v1546_v38, %v772_v25  ;;  %v735_v31 = vmul.f32 %v1088_v49, %v1496_v18  ;;  %1097 = vrsqrt.f32 %v676_v61  ;;  %v646_v36 = vmul.f32 0.0078125, %v614_v44 }
 0x1a5   :  { %842 = vst [vmem:[#allocation8 + $0xa8] sm:$0xff] %v810_v42  ;;  %v773_v41 = vmul.f32 %v1540_v33, %v734_v39  ;;  %1099 = vrsqrt.f32 %v677_v55 }
 0x1a6   :  { %v1090_v0 = vpop.eup %1089  ;;  %843 = vst [vmem:[#allocation8 + $0xb0] sm:$0xff] %v811_v56  ;;  %v774_v16 = vmul.f32 %v1540_v33, %v735_v31  ;;  %v678_v54 = vadd.f32 1e-05, %v646_v36 }
 0x1a7   :  { %v1092_v51 = vpop.eup %1091  ;;  %v812_v5 = vadd.f32 %v1546_v38, %v773_v41  ;;  %v736_v32 = vmul.f32 %v1090_v0, %v1501_v27 }
 0x1a8   :  { %v813_v53 = vadd.f32 %v1546_v38, %v774_v16  ;;  %v737_v18 = vmul.f32 %v1092_v51, %v1506_v34  ;;  %1101 = vrsqrt.f32 %v678_v54 }
 0x1a9   :  { %844 = vst [vmem:[#allocation8 + $0xb8] sm:$0xff] %v812_v5  ;;  %v775_v46 = vmul.f32 %v1540_v33, %v736_v32 }
 0x1aa   :  { %v1094_v1 = vpop.eup %1093  ;;  %845 = vst [vmem:[#allocation8 + $0xc0] sm:$0xff] %v813_v53  ;;  %v776_v57 = vmul.f32 %v1540_v33, %v737_v18 }
 0x1ab   :  { %v1096_v29 = vpop.eup %1095  ;;  %v814_v20 = vadd.f32 %v1546_v38, %v775_v46  ;;  %v738_v43 = vmul.f32 %v1094_v1, %v1511_v50 }
 0x1ac   :  { %v815_v58 = vadd.f32 %v1546_v38, %v776_v57  ;;  %v739_v27 = vmul.f32 %v1096_v29, %v1516_v63 }
 0x1ad   :  { %846 = vst [vmem:[#allocation8 + $0xc8] sm:$0xff] %v814_v20  ;;  %v777_v34 = vmul.f32 %v1540_v33, %v738_v43 }
 0x1ae   :  { %v1098_v3 = vpop.eup %1097  ;;  %847 = vst [vmem:[#allocation8 + $0xd0] sm:$0xff] %v815_v58  ;;  %v778_v4 = vmul.f32 %v1540_v33, %v739_v27 }
 0x1af   :  { %v1100_v45 = vpop.eup %1099  ;;  %v816_v9 = vadd.f32 %v1546_v38, %v777_v34  ;;  %v740_v47 = vmul.f32 %v1098_v3, %v1521_v10 }
 0x1b0   :  { %v817_v59 = vadd.f32 %v1546_v38, %v778_v4  ;;  %v741_v50 = vmul.f32 %v1100_v45, %v1526_v19 }
 0x1b1   :  { %848 = vst [vmem:[#allocation8 + $0xd8] sm:$0xff] %v816_v9  ;;  %v779_v7 = vmul.f32 %v1540_v33, %v740_v47 }
 0x1b2   :  { %v1102_v63 = vpop.eup %1101  ;;  %849 = vst [vmem:[#allocation8 + $0xe0] sm:$0xff] %v817_v59  ;;  %v780_v48 = vmul.f32 %v1540_v33, %v741_v50 }
 0x1b3   :  { %v818_v15 = vadd.f32 %v1546_v38, %v779_v7  ;;  %v742_v21 = vmul.f32 %v1102_v63, %v1531_v35 }
 0x1b4   :  { %v819_v2 = vadd.f32 %v1546_v38, %v780_v48 }
 0x1b5   :  { %850 = vst [vmem:[#allocation8 + $0xe8] sm:$0xff] %v818_v15  ;;  %v781_v10 = vmul.f32 %v1540_v33, %v742_v21 }
 0x1b6   :  { %851 = vst [vmem:[#allocation8 + $0xf0] sm:$0xff] %v819_v2 }
 0x1b7   :  { %v820_v19 = vadd.f32 %v1546_v38, %v781_v10 }
 0x1b9   :  { %852 = vst [vmem:[#allocation8 + $0xf8] sm:$0xff] %v820_v19 }
 0x1ba   :  { %1180 = shalt.err (!%p1177_p0)
}
 0x1bb   :  { %s1181_s12 = scalar_lea.hbm %s1663_s5, 4096 }
 0x1bc   :  { %p1182_p1 = scmp.ne.s32.totalorder %s1663_s5, %s1181_s12  ;;  %p1185_p2 = scmp.lt.u32.totalorder %s1181_s12, %s1663_s5 }
 0x1be   :  { %p1187_p3 = pnand %p1185_p2, %p1182_p1 }
 0x1c0   :  { %1190 = shalt.err (!%p1187_p3)
}
 0x1c1   :  { %864 = dma.vmem_to_hbm [thread:$0]  %s859_s4, 4096, %s1663_s5, [#allocation4], %s1202_s0, %s1202_s0, %s1203_s21  }
 0x1c2   :  { %1195 = dma.done.wait [#allocation4], 4096  }
 0x1c3   :  { %1196 = vsyncadd [#allocation4], 4294963200 }
 0x1c4   :  { %868 = vsyncpa [#allocation3], 1 }
 0x1c5   :  { %869 = vsyncpa [#allocation6], 1 }
 0x1c6   :  { %870 = vsyncpa [#allocation4], 1 }

</bundles_post_ra>
